<compile_context>
chip_gen: v6e
topology: v6e:2x2x1
jax: 0.10.0
libtpu: 0.0.40
codegen_flags: <defaults>
</compile_context>

<pallas_src>
import jax
import jax.numpy as jnp
from jax.experimental import pallas as pl
from jax.experimental.pallas import tpu as pltpu

_NEG_INF = -1e30  # pad-column bias: exp(pad_logit - max) underflows to 0 in f32


def _round_up(x: int, m: int) -> int:
    return (x + m - 1) // m * m


def _classifier_kernel(x_ref, w1_ref, b1_ref, w2_ref, b2_ref, out_ref):
    """One batch tile of: softmax(relu(x @ W1 + b1) @ W2 + b2, dim=1).

    x arrives as f32 (HBM traffic minimized) and is cast to bf16 on the VPU;
    W1/W2 are bf16 residents; accumulation and all elementwise math (bias,
    ReLU, softmax) stay in f32.
    """
    # fc1: bf16 x bf16 -> f32 accumulate on the MXU, then bias + ReLU on VPU.
    x = x_ref[...].astype(jnp.bfloat16)                  # VPU cast (slack slot)
    h = jnp.dot(x, w1_ref[...], preferred_element_type=jnp.float32)
    h = jnp.maximum(h + b1_ref[...], 0.0)                # (tb, H_pad) f32

    # fc2: re-narrow activations for the MXU, accumulate in f32.
    logits = jnp.dot(h.astype(jnp.bfloat16), w2_ref[...],
                     preferred_element_type=jnp.float32)
    logits = logits + b2_ref[...]                        # pad lanes -> -1e30

    # Numerically stable softmax along dim=1 (padded columns exp to 0).
    # Exact divide: rows sum to 1 to f32 precision (kernel is DMA-bound,
    # so the exact EUP/VPU divide costs nothing on the critical path).
    m = jnp.max(logits, axis=-1, keepdims=True)
    e = jnp.exp(logits - m)
    denom = jnp.sum(e, axis=-1, keepdims=True)
    out_ref[...] = (e / denom).astype(out_ref.dtype)


def classifier_forward(x, w1, b1, w2, b2, *, tile_b: int = 1024,
                       out_dtype=jnp.float32):
    """Forward pass of the MLP classifier.

    x : (B, D_in) float32
    w1: (D_in, H) float32    (transpose of torch Linear.weight)
    b1: (H,) or (1, H) float32
    w2: (H, C) float32
    b2: (C,) or (1, C) float32
    Returns (B, C) `out_dtype` softmax probabilities (f32 by default; pass
    jnp.bfloat16 to halve output writeback traffic if downstream allows).
    """
    B, D_in = x.shape
    H = w1.shape[1]
    C = w2.shape[1]
    b1 = jnp.reshape(b1, (1, H)).astype(jnp.float32)
    b2 = jnp.reshape(b2, (1, C)).astype(jnp.float32)

    # Lane-align only the *output* feature dims (hidden / classes) to 128.
    # D_in stays unpadded: a full-extent last dim in the BlockSpec is legal.
    H_pad = _round_up(H, 128)
    C_pad = _round_up(C, 128)

    # Batch tile: multiple of 16 sublanes (bf16 packing), capped by padded B.
    b16 = _round_up(B, 16)
    tb = min(_round_up(tile_b, 16), b16)
    # v7x has 2 TensorCores sharing the grid's "parallel" axis: when the batch
    # is big enough, cap the tile so the grid always has >= 2 steps.
    if b16 >= 256 and tb >= b16:
        tb = min(tb, _round_up((b16 + 1) // 2, 16))
    B_pad = _round_up(B, tb)

    # x stays f32 and unpadded along features; only pad batch rows if needed
    # (tail rows are dropped after the call).
    if B_pad != B:
        x_p = jnp.zeros((B_pad, D_in), jnp.float32).at[:B, :].set(x)
    else:
        x_p = x.astype(jnp.float32)

    # Resident weights: bf16 MXU operands, output dims lane-padded.
    w1_b = jnp.zeros((D_in, H_pad), jnp.float32).at[:, :H].set(w1).astype(jnp.bfloat16)
    w2_b = jnp.zeros((H_pad, C_pad), jnp.float32).at[:H, :C].set(w2).astype(jnp.bfloat16)
    b1_p = jnp.zeros((1, H_pad), jnp.float32).at[:, :H].set(b1)
    # fc2 pad bias = -1e30 so padded logit columns softmax to exactly 0.
    b2_p = jnp.full((1, C_pad), _NEG_INF, jnp.float32).at[:, :C].set(b2)

    grid = (B_pad // tb,)

    out_bytes = B_pad * C_pad * jnp.dtype(out_dtype).itemsize
    cost = pl.CostEstimate(
        flops=2 * B_pad * (D_in * H_pad + H_pad * C_pad),
        transcendentals=B_pad * C_pad,  # exp
        bytes_accessed=(x_p.size * 4 + w1_b.size * 2 + w2_b.size * 2
                        + b1_p.size * 4 + b2_p.size * 4 + out_bytes),
    )

    out = pl.pallas_call(
        _classifier_kernel,
        out_shape=jax.ShapeDtypeStruct((B_pad, C_pad), out_dtype),
        grid_spec=pltpu.PrefetchScalarGridSpec(
            num_scalar_prefetch=0,
            grid=grid,
            in_specs=[
                pl.BlockSpec((tb, D_in), lambda i: (i, 0)),      # x tile (f32)
                pl.BlockSpec((D_in, H_pad), lambda i: (0, 0)),   # W1 (resident bf16)
                pl.BlockSpec((1, H_pad), lambda i: (0, 0)),      # b1 (f32)
                pl.BlockSpec((H_pad, C_pad), lambda i: (0, 0)),  # W2 (resident bf16)
                pl.BlockSpec((1, C_pad), lambda i: (0, 0)),      # b2 (-1e30 pad)
            ],
            out_specs=pl.BlockSpec((tb, C_pad), lambda i: (i, 0)),
        ),
        compiler_params=pltpu.CompilerParams(
            dimension_semantics=("parallel",),   # batch tiles split across TCs
        ),
        cost_estimate=cost,
    )(x_p, w1_b, b1_p, w2_b, b2_p)

    return out[:B, :C]


def _reference_forward(x, w1, b1, w2, b2):
    """Pure-JAX reference mirroring the kernel's bf16-operand / f32-accum math."""
    h = jnp.dot(x.astype(jnp.bfloat16), w1.astype(jnp.bfloat16),
                preferred_element_type=jnp.float32)
    h = jnp.maximum(h + b1.reshape(1, -1), 0.0)
    logits = jnp.dot(h.astype(jnp.bfloat16), w2.astype(jnp.bfloat16),
                     preferred_element_type=jnp.float32) + b2.reshape(1, -1)
    return jax.nn.softmax(logits, axis=1)


if __name__ == "__main__":
    # MNIST-shaped but small: batch=24 (not a tile multiple -> exercises batch
    # padding), input=784, hidden=32 (-> padded to 128), classes=10 (-> 128).
    B, D_IN, HIDDEN, N_CLASSES = 24, 784, 32, 10

    key = jax.random.PRNGKey(0)
    kx, kw1, kb1, kw2, kb2 = jax.random.split(key, 5)

    x = jax.random.normal(kx, (B, D_IN), dtype=jnp.float32)
    # Deterministic synthetic parameters (Linear-like scale), stored as (in, out).
    w1 = jax.random.normal(kw1, (D_IN, HIDDEN), dtype=jnp.float32) / jnp.sqrt(D_IN)
    b1 = jax.random.normal(kb1, (HIDDEN,), dtype=jnp.float32) * 0.01
    w2 = jax.random.normal(kw2, (HIDDEN, N_CLASSES), dtype=jnp.float32) / jnp.sqrt(HIDDEN)
    b2 = jax.random.normal(kb2, (N_CLASSES,), dtype=jnp.float32) * 0.01

    # Small tile here to exercise a multi-step grid + padding at demo scale;
    # real workloads keep the default tile_b=1024.
    out = classifier_forward(x, w1, b1, w2, b2, tile_b=16)
    out = jax.block_until_ready(out)

    ref = _reference_forward(x, w1, b1, w2, b2)
    assert out.shape == (B, N_CLASSES)
    assert jnp.allclose(out, ref, atol=5e-3), "mismatch vs reference"
    assert jnp.allclose(jnp.sum(out, axis=1), 1.0, atol=1e-3), "softmax rows must sum to 1"

    print("KERNEL_OK")
</pallas_src>

<mosaic_0001>
module attributes {stable_mosaic.version = 11 : i64} {
  func.func @_classifier_kernel(%arg0: i32, %arg1: memref<16x784xf32, #tpu.memory_space<vmem>>, %arg2: memref<784x128xbf16, #tpu.memory_space<vmem>>, %arg3: memref<1x128xf32, #tpu.memory_space<vmem>>, %arg4: memref<128x128xbf16, #tpu.memory_space<vmem>>, %arg5: memref<1x128xf32, #tpu.memory_space<vmem>>, %arg6: memref<16x128xf32, #tpu.memory_space<vmem>>) attributes {dimension_semantics = [#tpu.dimension_semantics<parallel>], iteration_bounds = array<i64: 2>, scalar_prefetch = 0 : i64, scratch_operands = 0 : i64, tpu.core_type = #tpu.core_type<tc>, window_params = [{transform_indices = @transform_0, window_bounds = array<i64: 16, 784>}, {pipeline_mode = #tpu.pipeline_mode<synchronous>, transform_indices = @transform_1, window_bounds = array<i64: 784, 128>}, {pipeline_mode = #tpu.pipeline_mode<synchronous>, transform_indices = @transform_2, window_bounds = array<i64: 1, 128>}, {pipeline_mode = #tpu.pipeline_mode<synchronous>, transform_indices = @transform_3, window_bounds = array<i64: 128, 128>}, {pipeline_mode = #tpu.pipeline_mode<synchronous>, transform_indices = @transform_4, window_bounds = array<i64: 1, 128>}, {transform_indices = @transform_5, window_bounds = array<i64: 16, 128>}]} {
    %c0 = arith.constant 0 : index
    %c0_0 = arith.constant 0 : index
    %0 = vector.load %arg1[%c0, %c0_0] : memref<16x784xf32, #tpu.memory_space<vmem>>, vector<16x784xf32>
    %1 = arith.truncf %0 : vector<16x784xf32> to vector<16x784xbf16>
    %c0_1 = arith.constant 0 : index
    %c0_2 = arith.constant 0 : index
    %2 = vector.load %arg2[%c0_1, %c0_2] : memref<784x128xbf16, #tpu.memory_space<vmem>>, vector<784x128xbf16>
    %cst = arith.constant dense<0.000000e+00> : vector<16x128xf32>
    %3 = tpu.matmul %1, %2, %cst {dimension_numbers = #tpu.dot_dimension_numbers<[1], [0], [0], [1], [0, 0, 1, 1], [], []>} : vector<16x784xbf16>, vector<784x128xbf16>, vector<16x128xf32> -> vector<16x128xf32>
    %c0_3 = arith.constant 0 : index
    %c0_4 = arith.constant 0 : index
    %4 = vector.load %arg3[%c0_3, %c0_4] : memref<1x128xf32, #tpu.memory_space<vmem>>, vector<1x128xf32>
    %5 = vector.broadcast %4 : vector<1x128xf32> to vector<16x128xf32>
    %6 = arith.addf %3, %5 : vector<16x128xf32>
    %cst_5 = arith.constant 0.000000e+00 : f32
    %7 = vector.broadcast %cst_5 : f32 to vector<16x128xf32>
    %8 = arith.maximumf %6, %7 : vector<16x128xf32>
    %9 = arith.truncf %8 : vector<16x128xf32> to vector<16x128xbf16>
    %c0_6 = arith.constant 0 : index
    %c0_7 = arith.constant 0 : index
    %10 = vector.load %arg4[%c0_6, %c0_7] : memref<128x128xbf16, #tpu.memory_space<vmem>>, vector<128x128xbf16>
    %cst_8 = arith.constant dense<0.000000e+00> : vector<16x128xf32>
    %11 = tpu.matmul %9, %10, %cst_8 {dimension_numbers = #tpu.dot_dimension_numbers<[1], [0], [0], [1], [0, 0, 1, 1], [], []>} : vector<16x128xbf16>, vector<128x128xbf16>, vector<16x128xf32> -> vector<16x128xf32>
    %c0_9 = arith.constant 0 : index
    %c0_10 = arith.constant 0 : index
    %12 = vector.load %arg5[%c0_9, %c0_10] : memref<1x128xf32, #tpu.memory_space<vmem>>, vector<1x128xf32>
    %13 = vector.broadcast %12 : vector<1x128xf32> to vector<16x128xf32>
    %14 = arith.addf %11, %13 : vector<16x128xf32>
    %cst_11 = arith.constant dense<0xFF800000> : vector<16xf32>
    %15 = vector.multi_reduction <maximumf>, %14, %cst_11 [1] : vector<16x128xf32> to vector<16xf32>
    %16 = vector.shape_cast %15 : vector<16xf32> to vector<16x1xf32>
    %17 = vector.broadcast %16 : vector<16x1xf32> to vector<16x128xf32>
    %18 = arith.subf %14, %17 : vector<16x128xf32>
    %19 = math.exp %18 : vector<16x128xf32>
    %cst_12 = arith.constant dense<0.000000e+00> : vector<16xf32>
    %20 = vector.multi_reduction <add>, %19, %cst_12 [1] : vector<16x128xf32> to vector<16xf32>
    %21 = vector.shape_cast %20 : vector<16xf32> to vector<16x1xf32>
    %22 = vector.broadcast %21 : vector<16x1xf32> to vector<16x128xf32>
    %23 = arith.divf %19, %22 : vector<16x128xf32>
    %c0_13 = arith.constant 0 : index
    %c0_14 = arith.constant 0 : index
    %24 = vector.load %arg6[%c0_13, %c0_14] : memref<16x128xf32, #tpu.memory_space<vmem>>, vector<16x128xf32>
    tpu.vector_store %arg6[%c0_13, %c0_14], %23 {strides = array<i32>} : memref<16x128xf32, #tpu.memory_space<vmem>>, vector<16x128xf32>,
    return
  }
  func.func @transform_0(%arg0: i32) -> (i32, i32) {
    %c0_i32 = arith.constant 0 : i32
    %c0_i32_0 = arith.constant 0 : i32
    return %arg0, %c0_i32 : i32, i32
  }
  func.func @transform_1(%arg0: i32) -> (i32, i32) {
    %c0_i32 = arith.constant 0 : i32
    %c0_i32_0 = arith.constant 0 : i32
    %c0_i32_1 = arith.constant 0 : i32
    return %c0_i32, %c0_i32_0 : i32, i32
  }
  func.func @transform_2(%arg0: i32) -> (i32, i32) {
    %c0_i32 = arith.constant 0 : i32
    %c0_i32_0 = arith.constant 0 : i32
    %c0_i32_1 = arith.constant 0 : i32
    return %c0_i32, %c0_i32_0 : i32, i32
  }
  func.func @transform_3(%arg0: i32) -> (i32, i32) {
    %c0_i32 = arith.constant 0 : i32
    %c0_i32_0 = arith.constant 0 : i32
    %c0_i32_1 = arith.constant 0 : i32
    return %c0_i32, %c0_i32_0 : i32, i32
  }
  func.func @transform_4(%arg0: i32) -> (i32, i32) {
    %c0_i32 = arith.constant 0 : i32
    %c0_i32_0 = arith.constant 0 : i32
    %c0_i32_1 = arith.constant 0 : i32
    return %c0_i32, %c0_i32_0 : i32, i32
  }
  func.func @transform_5(%arg0: i32) -> (i32, i32) {
    %c0_i32 = arith.constant 0 : i32
    %c0_i32_0 = arith.constant 0 : i32
    return %arg0, %c0_i32 : i32, i32
  }
}

</mosaic_0001>

<bundles_post_ra>
// kernel: tpu_custom_call.1
= control target key start
LH: loop header
LB: loop body
LE: loop exit
PB: predicated region body
PF: predicated region fallthrough
CT: control target
= control target key end

     0   :  { %10 = vsyncpa [#allocation3], 0  ;;  %s1845_s0 = inlined_call_operand.hbm [shape: f32[32,784], index: 0, kind: input, shape index: {}]   ;;  %s1846_s1 = inlined_call_operand.hbm [shape: bf16[784,128], index: 1, kind: input, shape index: {}]   ;;  %s1847_s2 = inlined_call_operand.vmem [shape: f32[1,128], index: 2, kind: input, shape index: {}]   ;;  %s1848_s3 = inlined_call_operand.hbm [shape: bf16[128,128], index: 3, kind: input, shape index: {}]   ;;  %s1849_s4 = inlined_call_operand.vmem [shape: f32[1,128], index: 4, kind: input, shape index: {}]   ;;  %s1850_s5 = inlined_call_operand.hbm [shape: f32[32,128], index: 5, kind: output, shape index: {}]  }
   0x1   :  { %12 = vsyncpa [#allocation3 + $0x1], 0 }
   0x2   :  { %13 = vsyncpa [#allocation6], 0 }
   0x3   :  { %14 = vsyncpa [#allocation4], 0 }
   0x4   :  { %16 = vsyncpa [#allocation4 + $0x1], 0  ;;  %s1621_s18 = smov 0   ;;  %s1623_s19 = smov 0  }
   0x5   :  { %s1625_s20 = smov 0   ;;  %s1627_s21 = smov 0  }
   0x6 LB: > { %s1642_s22 = sadd.s32 4294967295, %s1577_s21   ;;  %s1105_s23 = sadd.s32 4294967294, %s1577_s21   ;;  %s1577_s21 = sphi %s1627_s21, %s1872_s21   ;;  %s1573_s20 = sphi %s1625_s20, %s1871_s20   ;;  %s1569_s19 = sphi %s1623_s19, %s1870_s19   ;;  %s1565_s18 = sphi %s1621_s18, %s1869_s18  }
   0x7   : > { %p42_p0 = scmp.ne.s32.totalorder %s1569_s19, %s1565_s18  ;;  %p1851_p1 = scmp.eq.s32.totalorder %s1642_s22, 0 }
   0x8   : > { %p156_p3 = scmp.eq.s32.totalorder %s1105_s23, 1  ;;  %p1106_p5 = scmp.ge.s32.totalorder %s1577_s21, 1 }
   0x9   : > { %p1651_p4 = por %p1851_p1, %p42_p0  ;;  %p163_p7 = scmp.lt.s32.totalorder %s1577_s21, 3 }
   0xa   : > { %p1656_p6 = por %p156_p3, %p42_p0  ;;  %s1579_s27 = smov [#allocation5]  }
   0xb   : > { %s1855_s24 = scalar_select %p1651_p4, 1, 0 }
   0xc   : > { %s1856_s25 = scalar_select %p1656_p6, 1, 0 }
   0xd   : > { %p1661_p8 = pnand %p1106_p5, %p163_p7  ;;  %s175_s28 = sshll.u32 %s1579_s27, 4  ;;  %s176_s28 = int_to_ptr.vmem [resolvable:$true] %s175_s28 }
   0xe   : > { %s1580_s30 = smov [#allocation7]   ;;  %s1440_s7 = scalar_lea.vmem %s176_s28, 6272 }
   0xf   : > { %s1857_s26 = scalar_select %p1661_p8, 1, 0 }
  0x10   : > { %p1301_p9 = pneg %p1661_p8  ;;  %s191_s6 = sshll.u32 %s1580_s30, 4  ;;  %s192_s6 = int_to_ptr.vmem [resolvable:$true] %s191_s6 }
  0x11   : > { %p1441_p13 = scmp.ne.s32.totalorder %s176_s28, %s1440_s7  ;;  %p1448_p5 = scmp.lt.s32.totalorder %s176_s28, %s176_s28 }
  0x12   : > { %p1670_p11 = pnand %p1301_p9, %p1851_p1  ;;  %p1449_p7 = scmp.lt.s32.totalorder %s1440_s7, %s1440_s7 }
  0x14   : > { %p1431_p12 = pneg %p1670_p11  ;;  %p1450_p10 = por %p1449_p7, %p1448_p5 }
  0x16   : > { %p1443_p0 = pnand %p1441_p13, %p1431_p12 }
  0x18   : > { %p1444_p3 = pneg %p1443_p0 }
  0x1a   : > { %p1451_p9 = pnand %p1450_p10, %p1444_p3 }
  0x1c   : > { %1454 = shalt.err (!%p1451_p9)
}
  0x1d   : > { %s1581_s8 = smov 64   ;;  %s1582_s9 = smov 4  }
  0x1e   : > { %1304 = dma.hbm_to_vmem [thread:$0]  (!%p1670_p11), %s1846_s1, 6272, %s176_s28, [#allocation6], %s1581_s8, %s1581_s8, %s1582_s9  }
  0x1f   : > { %s1466_s12 = scalar_lea.vmem %s192_s6, 1024  ;;  %p1474_p2 = scmp.lt.s32.totalorder %s192_s6, %s192_s6 }
  0x20   : > { %p1467_p1 = scmp.ne.s32.totalorder %s192_s6, %s1466_s12  ;;  %p1475_p6 = scmp.lt.s32.totalorder %s1466_s12, %s1466_s12 }
  0x22   : > { %p1469_p13 = pnand %p1467_p1, %p1431_p12  ;;  %p1476_p5 = por %p1475_p6, %p1474_p2 }
  0x24   : > { %p1470_p0 = pneg %p1469_p13 }
  0x26   : > { %p1477_p10 = pnand %p1476_p5, %p1470_p0 }
  0x28   : > { %1480 = shalt.err (!%p1477_p10)
}
  0x29   : > { %1307 = dma.hbm_to_vmem [thread:$0]  (!%p1670_p11), %s1848_s3, 1024, %s192_s6, [#allocation6], %s1581_s8, %s1581_s8, %s1582_s9  }
  0x2a   : > { %s1693_s15 = sadd.s32 1, %s1577_s21   ;;  %s29_s16 = sadd.s32 1, %s1573_s20 }
  0x2b   : > { %s26_s17 = ssub.s32 %s1577_s21, %s1693_s15  ;;  %p36_p1 = scmp.ne.s32.totalorder %s1573_s20, %s1569_s19 }
  0x2c   : > { %p27_p2 = scmp.eq.s32.totalorder %s26_s17, 0  ;;  %p37_p6 = scmp.eq.s32.totalorder %s1577_s21, 0 }
  0x2d   : > { %p1859_p12 = scmp.eq.s32.totalorder %s1642_s22, 1  ;;  %p1318_p7 = scmp.lt.s32.totalorder %s1577_s21, 2 }
  0x2e   : > { %s1709_s27 = scalar_select %p27_p2, %s1573_s20, %s29_s16  }
  0x2f   : > { %p1703_p3 = por %p1859_p12, %p36_p1  ;;  %p38_p9 = por %p37_p6, %p36_p1 }
  0x30   : > { %s208_s28 = sand.u32 1, %s1573_s20   ;;  %s1287_s30 = smul.u32 1792, %s1577_s21 }
  0x31   : > { %s1860_s23 = scalar_select %p1703_p3, 1, 0 }
  0x32   : > { %s1286_s29 = smul.u32 112, %s208_s28  ;;  %p1713_p11 = pnand %p1318_p7, %p38_p9 }
  0x33   : > { %s1720_s9 = scalar_lea.hbm %s1845_s0, %s1287_s30  ;;  %s1724_s12 = scalar_lea.sflag [#allocation3], %s208_s28 }
  0x34   : > { %s212_s10 = scalar_lea.vmem [#allocation2], %s1286_s29  ;;  %s1481_s13 = scalar_lea.hbm %s1720_s9, 1792 }
  0x35   : > { %s220_s11 = sshll.u32 %s212_s10, 4  ;;  %p1482_p13 = scmp.ne.s32.totalorder %s1720_s9, %s1481_s13  ;;  %s1722_s11 = int_to_ptr.vmem [resolvable:$true] %s220_s11 }
  0x36   : > { %p1483_p0 = pneg %p1713_p11  ;;  %s1486_s17 = scalar_lea.hbm %s1845_s0, 3584 }
  0x37   : > { %p1487_p1 = scmp.lt.s32.totalorder %s1720_s9, %s1845_s0  ;;  %p1488_p2 = scmp.lt.s32.totalorder %s1486_s17, %s1481_s13 }
  0x38   : > { %p1484_p5 = pnand %p1483_p0, %p1482_p13 }
  0x39   : > { %p1489_p6 = por %p1488_p2, %p1487_p1 }
  0x3a   : > { %p1485_p10 = pneg %p1484_p5 }
  0x3c   : > { %p1490_p12 = pnand %p1489_p6, %p1485_p10 }
  0x3e   : > { %1493 = shalt.err (!%p1490_p12)
}
  0x3f   : > { %s1494_s28 = scalar_lea.vmem %s1722_s11, 1792  ;;  %s1583_s29 = smov [#allocation2]  }
  0x40   : > { %p1495_p7 = scmp.ne.s32.totalorder %s1722_s11, %s1494_s28  ;;  %s1499_s8 = sshll.u32 %s1583_s29, 4  ;;  %s1500_s8 = int_to_ptr.vmem [resolvable:$false] %s1499_s8 }
  0x41   : > { %s1501_s10 = scalar_lea.vmem %s1500_s8, 3584  ;;  %p1502_p5 = scmp.lt.s32.totalorder %s1722_s11, %s1500_s8 }
  0x42   : > { %p1497_p9 = pnand %p1495_p7, %p1483_p0  ;;  %p1503_p3 = scmp.lt.s32.totalorder %s1501_s10, %s1494_s28 }
  0x44   : > { %p1498_p13 = pneg %p1497_p9  ;;  %p1504_p4 = por %p1503_p3, %p1502_p5 }
  0x46   : > { %p1505_p8 = pnand %p1504_p4, %p1498_p13 }
  0x48   : > { %1508 = shalt.err (!%p1505_p8)
}
  0x49   : > { %s1584_s13 = smov 896   ;;  %s1585_s14 = smov 56  }
  0x4a   : > { %1311 = dma.hbm_to_vmem [thread:$0]  (!%p1713_p11), %s1720_s9, 1792, %s1722_s11, %s1724_s12, %s1584_s13, %s1584_s13, %s1585_s14  }
  0x4b   : > { %p1862_p0 = scmp.ne.s32.totalorder %s1857_s26, 0 }
  0x4c   : > { %s1748_s16 = sand.u32 (!%p1862_p0), 1, %s1569_s19   ;;  %p1863_p4 = scmp.ne.s32.totalorder (!%p1862_p0), %s1855_s24, 0 }
  0x4d   : > { %232 = sbr.rel (%p1862_p0) target bundleno = 883 (0x373), region = 40  ;;  %s235_s30 = scalar_lea.sflag (!%p1862_p0), [#allocation3], %s1748_s16 }
  0x4e   : > { %s1288_s17 = smul.u32 (!%p1862_p0), 112, %s1748_s16 }
  0x50   : > { %s1752_s7 = scalar_lea.vmem (!%p1862_p0), [#allocation2], %s1288_s17 }
  0x52   : > { %1552 = dma.done.wait (%p1863_p4), %s235_s30, 1792  }
  0x53   : > { %1554 = vsyncadd (%p1863_p4), %s235_s30, 4294965504  ;;  %p1864_p8 = scmp.eq.s32.totalorder %s1642_s22, 0 }
  0x55   : > { %1556 = dma.done.wait (%p1864_p8), [#allocation6], 7296   ;;  %p1865_p3 = pmov %p1864_p8 }
  0x56   : > { %v1364_v0 = vld [vmem:[#allocation5 + $0x78] sm:$0xff]   ;;  %v1368_v4 = vld [vmem:[#allocation5 + $0x70] sm:$0xff]   ;;  %v1372_v8 = vld [vmem:[#allocation5 + $0x68] sm:$0xff]   ;;  %v1586_v43 = vmov 0.0   ;;  %vm1587_vm0 = vmmov 0   ;;  %vm696_vm1 = vcmask 130048  }
  0x57   : > { %1558 = vsyncadd (%p1865_p3), [#allocation6], 4294960000  ;;  %v1365_v1 = vld [vmem:[#allocation5 + $0x38] sm:$0xff]   ;;  %1183 = vmatprep.subr.bf16.mxu0 %v1364_v0  ;;  %v1369_v5 = vld [vmem:[#allocation5 + $0x30] sm:$0xff]   ;;  %s1116_s11 = sshll.u32 %s1748_s16, 4  ;;  %s1182_s12 = sshll.u32 %s1642_s22, 8 }
  0x58   : > { %v1366_v2 = vld [vmem:[#allocation5 + $0xf8] sm:$0xff]   ;;  %1184 = vmatpush3.bf16.msra.mxu0 %v1365_v1  ;;  %v1370_v6 = vld [vmem:[#allocation5 + $0xf0] sm:$0xff]   ;;  %v1373_v9 = vld [vmem:[#allocation5 + $0x28] sm:$0xff]   ;;  %s272_s28 = scalar_lea.vmem [#allocation8], %s1116_s11  ;;  %s1800_s13 = scalar_lea.hbm %s1850_s5, %s1182_s12 }
  0x59   : > { %v1367_v3 = vld [vmem:[#allocation5 + $0xb8] sm:$0xff]   ;;  %1205 = vmatprep.subr.bf16.mxu1 %v1366_v2  ;;  %1185 = vmatprep.subr.bf16.mxu0 %v1368_v4  ;;  %v1371_v7 = vld [vmem:[#allocation5 + $0xb0] sm:$0xff]   ;;  %v1374_v10 = vld [vmem:[#allocation5 + $0xe8] sm:$0xff]   ;;  %s1013_s29 = sshll.u32 %s272_s28, 4  ;;  %s1000_s14 = scalar_lea.sflag [#allocation4], %s1748_s16  ;;  %s1802_s29 = int_to_ptr.vmem [resolvable:$true] %s1013_s29 }
  0x5a   : > { %1206 = vmatpush3.bf16.msra.mxu1 %v1367_v3  ;;  %v1375_v11 = vld [vmem:[#allocation5 + $0xa8] sm:$0xff]   ;;  %v1376_v12 = vld [vmem:[#allocation5 + $0x60] sm:$0xff]   ;;  %v1380_v16 = vld [vmem:[#allocation5 + $0x58] sm:$0xff]   ;;  %s1509_s17 = scalar_lea.vmem %s1802_s29, 256  ;;  %p1866_p10 = scmp.ne.s32.totalorder %s1860_s23, 0 }
  0x5b   : > { %1207 = vmatprep.subr.bf16.mxu1 %v1370_v6  ;;  %v1377_v13 = vld [vmem:[#allocation5 + $0x20] sm:$0xff]   ;;  %v1381_v17 = vld [vmem:[#allocation5 + $0x18] sm:$0xff]   ;;  %v1384_v20 = vld [vmem:[#allocation5 + $0x50] sm:$0xff]   ;;  %p1510_p11 = scmp.ne.s32.totalorder %s1802_s29, %s1509_s17  ;;  %s1588_s22 = smov [#allocation8]  }
  0x5c   : > { %1186 = vmatpush3.bf16.msra.mxu0 %v1369_v5  ;;  %v1378_v14 = vld [vmem:[#allocation5 + $0xe0] sm:$0xff]   ;;  %v1382_v18 = vld [vmem:[#allocation5 + $0xd8] sm:$0xff]   ;;  %v1385_v21 = vld [vmem:[#allocation5 + $0x10] sm:$0xff]   ;;  %s1513_s30 = sshll.u32 %s1588_s22, 4  ;;  %s1514_s30 = int_to_ptr.vmem [resolvable:$false] %s1513_s30 }
  0x5d   : > { %1187 = vmatprep.subr.bf16.mxu0 %v1372_v8  ;;  %v1379_v15 = vld [vmem:[#allocation5 + $0xa0] sm:$0xff]   ;;  %v1383_v19 = vld [vmem:[#allocation5 + $0x98] sm:$0xff]   ;;  %v1386_v22 = vld [vmem:[#allocation5 + $0xd0] sm:$0xff]   ;;  %p1511_p1 = pnand %p1510_p11, %p1866_p10  ;;  %p1516_p6 = scmp.lt.s32.totalorder %s1802_s29, %s1514_s30 }
  0x5e   : > { %1208 = vmatpush3.bf16.msra.mxu1 %v1371_v7  ;;  %v1387_v23 = vld [vmem:[#allocation5 + $0x90] sm:$0xff]   ;;  %v1388_v24 = vld [vmem:[#allocation5 + $0x48] sm:$0xff]   ;;  %v1392_v28 = vld [vmem:[#allocation5 + $0x40] sm:$0xff]  }
  0x5f   : > { %1209 = vmatprep.subr.bf16.mxu1 %v1374_v10  ;;  %v1389_v25 = vld [vmem:[#allocation5 + $0x8] sm:$0xff]   ;;  %v1393_v29 = vld [vmem:[#allocation5] sm:$0xff]   ;;  %v1396_v38 = vld [vmem:[#allocation5 + $0x178] sm:$0xff]   ;;  %p1512_p2 = pneg %p1511_p1 }
  0x60   : > { %1188 = vmatpush3.bf16.msra.mxu0 %v1373_v9  ;;  %v1390_v26 = vld [vmem:[#allocation5 + $0xc8] sm:$0xff]   ;;  %v1394_v30 = vld [vmem:[#allocation5 + $0xc0] sm:$0xff]   ;;  %v1397_v42 = vld [vmem:[#allocation5 + $0x138] sm:$0xff]  }
  0x61   : > { %1189 = vmatprep.subr.bf16.mxu0 %v1376_v12  ;;  %v1391_v27 = vld [vmem:[#allocation5 + $0x88] sm:$0xff]   ;;  %v284_v32 = vld [vmem:[%s1752_s7 + $0x40] sm:$0xff]  ;;  %v286_v40 = vld [vmem:[%s1752_s7 + $0x50] sm:$0xff] }
  0x62   : > { %1210 = vmatpush3.bf16.msra.mxu1 %v1375_v11  ;;  %v277_v31 = vld [vmem:[%s1752_s7 + $0x8] sm:$0xff]  ;;  %v1395_v34 = vld [vmem:[#allocation5 + $0x80] sm:$0xff]   ;;  %v283_v36 = vld [vmem:[%s1752_s7 + $0x38] sm:$0xff] }
  0x63   : > { %1211 = vmatprep.subr.bf16.mxu1 %v1378_v14  ;;  %v291_v33 = vpack.c.bf16 %v284_v32, %v277_v31  ;;  %v276_v35 = vld [vmem:[%s1752_s7] sm:$0xff]  ;;  %v279_v39 = vld [vmem:[%s1752_s7 + $0x18] sm:$0xff]  ;;  %v278_v44 = vld [vmem:[%s1752_s7 + $0x10] sm:$0xff] }
  0x64   : > { %1190 = vmatpush3.bf16.msra.mxu0 %v1377_v13  ;;  %v290_v37 = vpack.c.bf16 %v283_v36, %v276_v35  ;;  %v293_v41 = vpack.c.bf16 %v286_v40, %v279_v39  ;;  %v285_v45 = vld [vmem:[%s1752_s7 + $0x48] sm:$0xff]  ;;  %v1398_v47 = vld [vmem:[#allocation5 + $0x170] sm:$0xff]   ;;  %v1402_v51 = vld [vmem:[#allocation5 + $0x160] sm:$0xff]  }
  0x65   : > { %1191 = vmatprep.subr.bf16.mxu0 %v1380_v16  ;;  %732 = vmatprep.mubr.bf16.mxu0 %v291_v33  ;;  %v292_v46 = vpack.c.bf16 %v285_v45, %v278_v44  ;;  %v1399_v48 = vld [vmem:[#allocation5 + $0x130] sm:$0xff]   ;;  %v1400_v49 = vld [vmem:[#allocation5 + $0x168] sm:$0xff]   ;;  %v1403_v52 = vld [vmem:[#allocation5 + $0x120] sm:$0xff]  }
  0x66   : > { %1212 = vmatpush3.bf16.msra.mxu1 %v1379_v15  ;;  %773 = vmatprep.mubr.bf16.mxu1 %v293_v41  ;;  %v1401_v50 = vld [vmem:[#allocation5 + $0x128] sm:$0xff]   ;;  %v1404_v53 = vld [vmem:[#allocation5 + $0x158] sm:$0xff]   ;;  %v1406_v55 = vld [vmem:[#allocation5 + $0x150] sm:$0xff]  }
  0x67   : > { %1213 = vmatprep.subr.bf16.mxu1 %v1382_v18  ;;  %v1405_v54 = vld [vmem:[#allocation5 + $0x118] sm:$0xff]   ;;  %v1412_v56 = vld [vmem:[#allocation5 + $0x180] sm:$0xff]   ;;  %v1407_v58 = vld [vmem:[#allocation5 + $0x110] sm:$0xff]  }
  0x68   : > { %1192 = vmatpush3.bf16.msra.mxu0 %v1381_v17  ;;  %v281_v57 = vld [vmem:[%s1752_s7 + $0x28] sm:$0xff]  ;;  %v288_v60 = vld [vmem:[%s1752_s7 + $0x60] sm:$0xff]  ;;  %v282_v62 = vld [vmem:[%s1752_s7 + $0x30] sm:$0xff] }
  0x69   : > { %1193 = vmatprep.subr.bf16.mxu0 %v1384_v20  ;;  %v1408_v59 = vld [vmem:[#allocation5 + $0x148] sm:$0xff]   ;;  %v295_v61 = vpack.c.bf16 %v288_v60, %v281_v57  ;;  %v1410_v2 = vld [vmem:[#allocation5 + $0x140] sm:$0xff]   ;;  %v1414_v8 = vld [vmem:[#allocation7 + $0x30] sm:$0xff]  }
  0x6a   : > { %1214 = vmatpush3.bf16.msra.mxu1 %v1383_v19  ;;  %v289_v63 = vld [vmem:[%s1752_s7 + $0x68] sm:$0xff]  ;;  %v1411_v3 = vld [vmem:[#allocation5 + $0x100] sm:$0xff]   ;;  %v287_v5 = vld [vmem:[%s1752_s7 + $0x58] sm:$0xff] }
  0x6b   : > { %1215 = vmatprep.subr.bf16.mxu1 %v1386_v22  ;;  %v296_v0 = vpack.c.bf16 %v289_v63, %v282_v62  ;;  %v1409_v1 = vld [vmem:[#allocation5 + $0x108] sm:$0xff]   ;;  %v280_v4 = vld [vmem:[%s1752_s7 + $0x20] sm:$0xff]  ;;  %v1418_v12 = vld [vmem:[#allocation7 + $0x10] sm:$0xff]   ;;  %s1515_s7 = scalar_lea.vmem %s1514_s30, 512 }
  0x6c   : > { %1194 = vmatpush3.bf16.msra.mxu0 %v1385_v21  ;;  %v294_v6 = vpack.c.bf16 %v287_v5, %v280_v4  ;;  %v1413_v7 = vld [vmem:[#allocation7 + $0x38] sm:$0xff]   ;;  %v1415_v9 = vld [vmem:[#allocation7 + $0x28] sm:$0xff]   ;;  %v1416_v10 = vld [vmem:[#allocation7 + $0x20] sm:$0xff]   ;;  %p1517_p12 = scmp.lt.s32.totalorder %s1515_s7, %s1509_s17 }
  0x6d   : > { %1195 = vmatprep.subr.bf16.mxu0 %v1388_v24  ;;  %v1417_v11 = vld [vmem:[#allocation7 + $0x18] sm:$0xff]   ;;  %v1419_v13 = vld [vmem:[#allocation7 + $0x8] sm:$0xff]   ;;  %v1420_v14 = vld [vmem:[#allocation7] sm:$0xff]  }
  0x6e   : > { %1216 = vmatpush3.bf16.msra.mxu1 %v1387_v23  ;;  %p1518_p7 = por %p1517_p12, %p1516_p6 }
  0x6f   : > { %1217 = vmatprep.subr.bf16.mxu1 %v1390_v26 }
  0x70   : > { %1196 = vmatpush3.bf16.msra.mxu0 %v1389_v25  ;;  %p1519_p9 = pnand %p1518_p7, %p1512_p2 }
  0x71   : > { %1197 = vmatprep.subr.bf16.mxu0 %v1392_v28 }
  0x72   : > { %1218 = vmatpush3.bf16.msra.mxu1 %v1391_v27  ;;  %v1117_v27 = vld [vmem:[%s1847_s2] ss:$0 sm:$0xff] }
  0x73   : > { %1219 = vmatprep.subr.bf16.mxu1 %v1394_v30 }
  0x74   : > { %1198 = vmatpush3.bf16.msra.mxu0 %v1393_v29 }
  0x75   : > { %1227 = vmatprep.subr.bf16.mxu0 %v1396_v38 }
  0x76   : > { %1220 = vmatpush3.bf16.msra.mxu1 %v1395_v34 }
  0x77   : > { %1260 = vmatprep.subr.bf16.mxu1 %v1586_v43  ;;  %733 = vmatmul.mubr.bf16.vlgmr.msra.gmra.mxu0 %v290_v37 }
  0x78   : > { %1228 = vmatpush3.bf16.msra.mxu0 %v1397_v42  ;;  %814 = vmatprep.mubr.bf16.mxu0 %v295_v61 }
  0x79   : > { %774 = vmatmul.mubr.bf16.vlgmr.msra.gmra.mxu1 %v292_v46  ;;  %1229 = vmatprep.subr.bf16.mxu0 %v1398_v47 }
  0x7a   : > { %1262 = vmatprep.mubr.msk.bf16.mxu1 %vm1587_vm0, %v1586_v43  ;;  %1261 = vmatpush3.bf16.msra.mxu1 %v1412_v56 }
  0x7b   : > { %1266 = vmatprep.subr.bf16.mxu1 %v1586_v43 }
  0x7c   : > { %1230 = vmatpush3.bf16.msra.mxu0 %v1399_v48 }
  0x7d   : > { %1231 = vmatprep.subr.bf16.mxu0 %v1400_v49  ;;  %v1168_v49 = vld [vmem:[%s1849_s4] ss:$0 sm:$0xff] }
  0x80   : > { %1232 = vmatpush3.bf16.msra.mxu0 %v1401_v50 }
  0x81   : > { %1233 = vmatprep.subr.bf16.mxu0 %v1402_v51  ;;  %1263 = vmatmul.mubr.msk.bf16.vlgmr.msra.gmra.mxu1 %vm696_vm1, %v296_v0 }
  0x82   : > { %1282 = vmatprep.mubr.msk.bf16.mxu1 %vm1587_vm0, %v1586_v43  ;;  %1267 = vmatpush3.bf16.msra.mxu1 %v1413_v7 }
  0x83   : > { %1268 = vmatprep.subr.bf16.mxu1 %v1586_v43 }
  0x84   : > { %1234 = vmatpush3.bf16.msra.mxu0 %v1403_v52 }
  0x85   : > { %1235 = vmatprep.subr.bf16.mxu0 %v1404_v53 }
  0x86   : > { %1269 = vmatpush3.bf16.msra.mxu1 %v1414_v8 }
  0x87   : > { %1270 = vmatprep.subr.bf16.mxu1 %v1586_v43 }
  0x88   : > { %1236 = vmatpush3.bf16.msra.mxu0 %v1405_v54 }
  0x89   : > { %1237 = vmatprep.subr.bf16.mxu0 %v1406_v55 }
  0x8a   : > { %1271 = vmatpush3.bf16.msra.mxu1 %v1415_v9 }
  0x8b   : > { %1272 = vmatprep.subr.bf16.mxu1 %v1586_v43 }
  0x8c   : > { %1238 = vmatpush3.bf16.msra.mxu0 %v1407_v58 }
  0x8d   : > { %1239 = vmatprep.subr.bf16.mxu0 %v1408_v59 }
  0x8e   : > { %1273 = vmatpush3.bf16.msra.mxu1 %v1416_v10 }
  0x8f   : > { %1274 = vmatprep.subr.bf16.mxu1 %v1586_v43 }
  0x90   : > { %1240 = vmatpush3.bf16.msra.mxu0 %v1409_v1 }
  0x91   : > { %1241 = vmatprep.subr.bf16.mxu0 %v1410_v2 }
  0x92   : > { %1275 = vmatpush3.bf16.msra.mxu1 %v1417_v11 }
  0x93   : > { %1276 = vmatprep.subr.bf16.mxu1 %v1586_v43 }
  0x94   : > { %1242 = vmatpush3.bf16.msra.mxu0 %v1411_v3 }
  0x96   : > { %1277 = vmatpush3.bf16.msra.mxu1 %v1418_v12 }
  0x97   : > { %815 = vmatmul.mubr.bf16.vlgmr.msra.gmra.mxu0 %v294_v6  ;;  %1278 = vmatprep.subr.bf16.mxu1 %v1586_v43 }
  0x9a   : > { %1279 = vmatpush3.bf16.msra.mxu1 %v1419_v13 }
  0x9b   : > { %1280 = vmatprep.subr.bf16.mxu1 %v1586_v43 }
  0x9e   : > { %1281 = vmatpush3.bf16.msra.mxu1 %v1420_v14 }
 0x137   : > { %v1199_v18 = vpop.f32.mrf.mxu0 }
 0x139   : > { %v1221_v15 = vpop.f32.mrf.mxu1  ;;  %v1200_v20 = vpop.f32.mrf.mxu0 }
 0x13a   : > { %v1201_v26 = vadd.f32 %v1200_v20, %v1199_v18 }
 0x13b   : > { %v1222_v16 = vpop.f32.mrf.mxu1  ;;  %v1202_v23 = vpop.f32.mrf.mxu0 }
 0x13c   : > { %v735_v29 = vadd.f32 %v1201_v26, %v1117_v27  ;;  %v1223_v30 = vadd.f32 %v1222_v16, %v1221_v15 }
 0x13d   : > { %v1224_v17 = vpop.f32.mrf.mxu1  ;;  %v1203_v28 = vpop.f32.mrf.mxu0 }
 0x13e   : > { %v1204_v31 = vadd.f32 %v1203_v28, %v1202_v23  ;;  %v776_v34 = vadd.f32 %v1223_v30, %v735_v29 }
 0x13f   : > { %v1225_v19 = vpop.f32.mrf.mxu1 }
 0x140   : > { %v738_v35 = vadd.f32 %v1204_v31, %v1117_v27  ;;  %v1226_v36 = vadd.f32 %v1225_v19, %v1224_v17 }
 0x141   : > { %v857_v21 = vpop.f32.mrf.mxu1 }
 0x142   : > { %v779_v41 = vadd.f32 %v1226_v36, %v738_v35 }
 0x143   : > { %v1264_v22 = vpop.f32.mrf.mxu1 }
 0x145   : > { %v860_v24 = vpop.f32.mrf.mxu1 }
 0x147   : > { %v1265_v25 = vpop.f32.mrf.mxu1 }
 0x157   : > { %v1243_v32 = vpop.f32.mrf.mxu0 }
 0x159   : > { %v1244_v33 = vpop.f32.mrf.mxu0 }
 0x15a   : > { %v1245_v37 = vadd.f32 %v1244_v33, %v1243_v32 }
 0x15b   : > { %v1246_v38 = vpop.f32.mrf.mxu0 }
 0x15c   : > { %v817_v39 = vadd.f32 %v1245_v37, %v776_v34 }
 0x15d   : > { %v1247_v40 = vpop.f32.mrf.mxu0 }
 0x15e   : > { %v1248_v42 = vadd.f32 %v1247_v40, %v1246_v38  ;;  %v858_v43 = vadd.f32 %v857_v21, %v817_v39 }
 0x160   : > { %v820_v44 = vadd.f32 %v1248_v42, %v779_v41  ;;  %v864_v46 = vmax.f32 %v858_v43, 0.0 }
 0x162   : > { %v861_v45 = vadd.f32 %v860_v24, %v820_v44 }
 0x164   : > { %v865_v47 = vmax.f32 %v861_v45, 0.0 }
 0x166   : > { %v866_v48 = vpack.c.bf16 %v865_v47, %v864_v46 }
 0x168   : > { %1283 = vmatmul.mubr.bf16.vlgmr.msra.gmra.mxu1 %v866_v48 }
 0x228   : > { %v972_v50 = vpop.f32.mrf.mxu1 }
 0x229   : > { %v973_v51 = vadd.f32 %v1168_v49, %v972_v50 }
 0x22a   : > { %v1284_v52 = vpop.f32.mrf.mxu1 }
 0x22b   : > { %979 = vmax.xlane.f32.xlu0 %v973_v51 }
 0x22c   : > { %v975_v53 = vpop.f32.mrf.mxu1 }
 0x22d   : > { %v976_v54 = vadd.f32 %v1168_v49, %v975_v53 }
 0x22e   : > { %v1285_v55 = vpop.f32.mrf.mxu1 }
 0x22f   : > { %981 = vmax.xlane.f32.xlu0 %v976_v54 }
 0x2b4   : > { %v980_v56 = vpop.xlane.xlu0 %979 }
 0x2b5   : > { %v983_v57 = vsub.f32 %v973_v51, %v980_v56 }
 0x2b7   : > { %v985_v58 = vmul.f32 1.442695, %v983_v57 }
 0x2b8   : > { %v982_v59 = vpop.xlane.xlu0 %981 }
 0x2b9   : > { %1421 = vpow2.f32 %v985_v58  ;;  %v984_v60 = vsub.f32 %v976_v54, %v982_v59 }
 0x2bb   : > { %v987_v61 = vmul.f32 1.442695, %v984_v60 }
 0x2bd   : > { %1423 = vpow2.f32 %v987_v61 }
 0x2c6   : > { %v1422_v62 = vpop.eup %1421 }
 0x2c7   : > { %989 = vadd.xlane.f32.xlu1 %v1422_v62 }
 0x2ca   : > { %v1424_v63 = vpop.eup %1423 }
 0x2cb   : > { %991 = vadd.xlane.f32.xlu1 %v1424_v63 }
 0x350   : > { %v990_v0 = vpop.xlane.xlu1 %989 }
 0x351   : > { %1425 = vrcp.f32 %v990_v0 }
 0x354   : > { %v992_v1 = vpop.xlane.xlu1 %991 }
 0x355   : > { %1427 = vrcp.f32 %v992_v1 }
 0x35e   : > { %v1426_v2 = vpop.eup %1425 }
 0x35f   : > { %v994_v3 = vmul.f32 %v1426_v2, %v1422_v62 }
 0x361   : > { %997 = vst [vmem:[%s272_s28] sm:$0xff] %v994_v3 }
 0x362   : > { %v1428_v4 = vpop.eup %1427 }
 0x363   : > { %v996_v5 = vmul.f32 %v1428_v4, %v1424_v63 }
 0x365   : > { %998 = vst [vmem:[%s272_s28 + $0x8] sm:$0xff] %v996_v5 }
 0x366   : > { %1522 = shalt.err (!%p1519_p9)
}
 0x367   : > { %s1523_s24 = scalar_lea.hbm %s1800_s13, 256  ;;  %s1527_s9 = scalar_lea.hbm %s1850_s5, 512 }
 0x368   : > { %p1524_p13 = scmp.ne.s32.totalorder %s1800_s13, %s1523_s24  ;;  %p1528_p4 = scmp.lt.s32.totalorder %s1800_s13, %s1850_s5 }
 0x369   : > { %p1529_p8 = scmp.lt.s32.totalorder %s1527_s9, %s1523_s24 }
 0x36a   : > { %p1525_p5 = pnand %p1524_p13, %p1866_p10 }
 0x36b   : > { %p1530_p3 = por %p1529_p8, %p1528_p4 }
 0x36c   : > { %p1526_p0 = pneg %p1525_p5 }
 0x36e   : > { %p1531_p11 = pnand %p1530_p3, %p1526_p0 }
 0x370   : > { %1534 = shalt.err (!%p1531_p11)
}
 0x371   : > { %s1589_s28 = smov 128   ;;  %s1590_s8 = smov 8  }
 0x372   : > { %1299 = dma.vmem_to_hbm [thread:$0]  (%p1866_p10), %s1802_s29, 256, %s1800_s13, %s1000_s14, %s1589_s28, %s1589_s28, %s1590_s8  }
 0x373 PF: > { %s1028_s10 = sand.u32 1, %s1565_s18   ;;  %p1867_p1 = scmp.ne.s32.totalorder %s1856_s25, 0 }
 0x374   : > { %p1868_p2 = scmp.ge.s32.totalorder %s1577_s21, 2  ;;  %s1029_s17 = scalar_lea.sflag [#allocation4], %s1028_s10 }
 0x376   : > { %p1313_p6 = pnand %p1868_p2, %p1867_p1 }
 0x378   : > { %p1314_p12 = pneg %p1313_p6 }
 0x37a   : > { %1560 = dma.done.wait (%p1314_p12), %s1029_s17, 256  }
 0x37b   : > { %1562 = vsyncadd (%p1314_p12), %s1029_s17, 4294967040  ;;  %p19_p7 = scmp.ge.s32.totalorder %s1693_s15, 4   ;;  %s1869_s18 = smov %s1569_s19 }
 0x37c   : > { %s1870_s19 = smov %s1573_s20  ;;  %s1871_s20 = smov %s1709_s27 }
 0x37d   : > { %s1872_s21 = smov %s1693_s15  ;;  %21 = sbr.rel (!%p19_p7) target bundleno = 6 (0x6), region = 93 }
 0x382   :  { %1034 = vsyncpa [#allocation3], 1 }
 0x383   :  { %1036 = vsyncpa [#allocation3 + $0x1], 1 }
 0x384   :  { %1037 = vsyncpa [#allocation6], 1 }
 0x385   :  { %1038 = vsyncpa [#allocation4], 1 }
 0x386   :  { %1040 = vsyncpa [#allocation4 + $0x1], 1 }

</bundles_post_ra>
